<compile_context>
chip_gen: v5e
topology: v5e:2x2
jax: 0.10.0
libtpu: 0.0.40
codegen_flags: <defaults>
</compile_context>

<pallas_src>
import jax
import jax.numpy as jnp
from jax.experimental import pallas as pl
from jax.experimental.pallas import tpu as pltpu

_IN = 784
_H1 = 128
_H2 = 64
_H2P = 128        # fc2 output padded to a full 128-lane width
_NC = 10
_NCP = 128        # logits padded to a full 128-lane width
_NEG = -1e30      # mask value baked into the padded logit-lane bias
_TB = 2048        # batch-tile cap (f32 x block 6.3 MiB x2 bufs -> fits v7x 64 MiB)


def _round_up(v, m):
    return ((v + m - 1) // m) * m


def _pick_tb(batch, cap):
    """Pick a batch tile: ~8 grid steps when possible, 8/128-row aligned,
    >=2 steps whenever B allows an 8-row split (v7x megacore), capped at `cap`."""
    if batch <= 8:
        return batch                      # single full block (tiny batches)
    tb = pl.cdiv(batch, 8)
    tb = _round_up(tb, 128 if tb >= 128 else 8)
    tb = min(tb, cap)
    if tb >= batch:
        tb = _round_up(pl.cdiv(batch, 2), 8)   # force >=2 steps if we can
        if tb >= batch:
            return batch
    return tb


def _mlp_kernel(x_ref, w1_ref, b1_ref, w2_ref, b2_ref, w3_ref, b3_ref, o_ref):
    # In-kernel cast: x is DMA'd in the caller's dtype (one HBM pass), bf16 for MXU.
    x = x_ref[...].astype(jnp.bfloat16)

    # Layer 1: (TB, 784) @ (784, 128) -- bf16 operands, f32 accumulation (MXU).
    h1 = jnp.dot(x, w1_ref[...], preferred_element_type=jnp.float32) + b1_ref[...]
    h1 = jnp.maximum(h1, 0.0).astype(jnp.bfloat16)

    # Layer 2: (TB, 128) @ (128, 128); columns 64..127 are zero padding, so the
    # padded h2 lanes are exactly relu(0 + 0) == 0.
    h2 = jnp.dot(h1, w2_ref[...], preferred_element_type=jnp.float32) + b2_ref[...]
    h2 = jnp.maximum(h2, 0.0).astype(jnp.bfloat16)

    # Layer 3: (TB, 128) @ (128, 128); padded logit lanes get a -1e30 bias.
    logits = jnp.dot(h2, w3_ref[...], preferred_element_type=jnp.float32) + b3_ref[...]

    # Numerically-stable log_softmax over the class axis.  Padded lanes sit at
    # ~-1e30, so exp(shifted) is exactly 0 there and never pollutes the sum.
    # NOTE: if a v6e/v7x bundle shows the EUP exp chain binding once DMA bytes
    # shrink, compute jnp.exp in bf16 there (not on v5e: no bf16 EUP).
    m = jnp.max(logits, axis=-1, keepdims=True)
    shifted = logits - m
    lse = jnp.log(jnp.sum(jnp.exp(shifted), axis=-1, keepdims=True))
    o_ref[...] = (shifted - lse).astype(o_ref.dtype)


def prepare_params(params):
    """One-time (hoisted out of the forward path) cast/pad of parameters.

    Input: (w1, b1, w2, b2, w3, b3) with w_i shaped (in_features, out_features)
    (transpose of torch nn.Linear.weight) and b_i shaped (out,) or (1, out).
    """
    w1, b1, w2, b2, w3, b3 = params
    w1p = w1.astype(jnp.bfloat16)
    b1p = jnp.asarray(b1, jnp.float32).reshape(1, _H1)
    w2p = jnp.zeros((_H1, _H2P), jnp.bfloat16).at[:, :_H2].set(w2.astype(jnp.bfloat16))
    b2p = jnp.zeros((1, _H2P), jnp.float32).at[:, :_H2].set(
        jnp.asarray(b2, jnp.float32).reshape(1, _H2))
    w3p = jnp.zeros((_H2P, _NCP), jnp.bfloat16).at[:_H2, :_NC].set(w3.astype(jnp.bfloat16))
    b3p = jnp.full((1, _NCP), _NEG, jnp.float32).at[:, :_NC].set(
        jnp.asarray(b3, jnp.float32).reshape(1, _NC))
    return (w1p, b1p, w2p, b2p, w3p, b3p)


def nn_mnist_forward(x, prepared_params, *, tile_b=_TB,
                     out_dtype=jnp.bfloat16, unpad=True):
    """x: any shape with 784 trailing elements per sample (e.g. (B,1,28,28)).

    prepared_params: output of prepare_params().
    unpad=True returns (B, 10); unpad=False returns the lane-dense padded
    (B, 128) block so callers can fuse the class slice into downstream ops.
    """
    w1p, b1p, w2p, b2p, w3p, b3p = prepared_params

    xf = x.reshape(-1, _IN)                 # reshape only: no extra dtype pass
    B = xf.shape[0]
    TB = _pick_tb(B, tile_b)
    grid = (pl.cdiv(B, TB),)

    rep = lambda shape: pl.BlockSpec(shape, lambda i: (0, 0))   # VMEM-resident

    flops = 2 * B * (_IN * _H1 + _H1 * _H2 + _H2 * _NC)
    bytes_accessed = (
        B * _IN * xf.dtype.itemsize                    # x (caller's dtype)
        + (w1p.size + w2p.size + w3p.size) * 2         # weights (bf16)
        + (b1p.size + b2p.size + b3p.size) * 4         # biases (f32)
        + B * _NCP * jnp.dtype(out_dtype).itemsize     # padded output
    )

    out_padded = pl.pallas_call(
        _mlp_kernel,
        out_shape=jax.ShapeDtypeStruct((B, _NCP), out_dtype),
        grid=grid,
        in_specs=[
            pl.BlockSpec((TB, _IN), lambda i: (i, 0)),
            rep((_IN, _H1)), rep((1, _H1)),
            rep((_H1, _H2P)), rep((1, _H2P)),
            rep((_H2P, _NCP)), rep((1, _NCP)),
        ],
        out_specs=pl.BlockSpec((TB, _NCP), lambda i: (i, 0)),
        compiler_params=pltpu.CompilerParams(
            dimension_semantics=("parallel",),
            vmem_limit_bytes=48 << 20,
        ),
        cost_estimate=pl.CostEstimate(
            flops=flops,
            transcendentals=B * _NCP,
            bytes_accessed=bytes_accessed,
        ),
    )(xf, w1p, b1p, w2p, b2p, w3p, b3p)

    if unpad:
        # NOTE: this slice is a separate read+write pass; prefer unpad=False
        # when the consumer (loss / argmax) can fuse the slice itself.
        return out_padded[:, :_NC]
    return out_padded


def init_params(key):
    """Deterministic synthetic parameters matching nn.Linear shapes (transposed)."""
    ks = jax.random.split(key, 6)

    def linear(kw, kb, fan_in, fan_out):
        bound = 1.0 / (fan_in ** 0.5)
        w = jax.random.uniform(kw, (fan_in, fan_out), jnp.float32, -bound, bound)
        b = jax.random.uniform(kb, (1, fan_out), jnp.float32, -bound, bound)
        return w, b

    w1, b1 = linear(ks[0], ks[1], 784, 128)
    w2, b2 = linear(ks[2], ks[3], 128, 64)
    w3, b3 = linear(ks[4], ks[5], 64, 10)
    return (w1, b1, w2, b2, w3, b3)


def _ref_forward(x, params):
    """Plain-JAX reference using the same bf16-operand / f32-accumulate math."""
    w1, b1, w2, b2, w3, b3 = params
    xf = x.reshape(-1, _IN)
    h1 = jnp.maximum(
        jnp.dot(xf.astype(jnp.bfloat16), w1.astype(jnp.bfloat16),
                preferred_element_type=jnp.float32) + b1.reshape(1, -1), 0.0)
    h2 = jnp.maximum(
        jnp.dot(h1.astype(jnp.bfloat16), w2.astype(jnp.bfloat16),
                preferred_element_type=jnp.float32) + b2.reshape(1, -1), 0.0)
    logits = jnp.dot(h2.astype(jnp.bfloat16), w3.astype(jnp.bfloat16),
                     preferred_element_type=jnp.float32) + b3.reshape(1, -1)
    return logits - jax.scipy.special.logsumexp(logits, axis=1, keepdims=True)


if __name__ == "__main__":
    key = jax.random.PRNGKey(0)
    pkey, xkey, xkey2 = jax.random.split(key, 3)
    params = init_params(pkey)
    prepared = prepare_params(params)          # hoisted: one-time weight prep

    fwd = jax.jit(lambda xx: nn_mnist_forward(xx, prepared))

    # 1) Small MNIST-like batch: (B=2, C=1, H=28, W=28) -> single-block grid.
    x = jax.random.normal(xkey, (2, 1, 28, 28), jnp.float32)
    out = jax.block_until_ready(fwd(x))
    ref = _ref_forward(x, params)
    assert out.shape == (2, _NC)
    assert bool(jnp.all(jnp.isfinite(out.astype(jnp.float32))))
    assert jnp.allclose(out.astype(jnp.float32), ref, atol=3e-2, rtol=3e-2)

    # 2) Larger, non-multiple-of-tile batch: exercises multi-step pipelined grid
    #    and the partial last block (outputs past B are clipped by Pallas).
    x2 = jax.random.normal(xkey2, (300, _IN), jnp.float32)
    out2 = jax.block_until_ready(fwd(x2))
    ref2 = _ref_forward(x2, params)
    assert out2.shape == (300, _NC)
    assert bool(jnp.all(jnp.isfinite(out2.astype(jnp.float32))))
    assert jnp.allclose(out2.astype(jnp.float32), ref2, atol=3e-2, rtol=3e-2)

    print("KERNEL_OK")
</pallas_src>

<mosaic_0001>
module attributes {stable_mosaic.version = 11 : i64} {
  func.func @_mlp_kernel(%arg0: i32, %arg1: memref<2x784xf32, #tpu.memory_space<vmem>>, %arg2: memref<784x128xbf16, #tpu.memory_space<vmem>>, %arg3: memref<1x128xf32, #tpu.memory_space<vmem>>, %arg4: memref<128x128xbf16, #tpu.memory_space<vmem>>, %arg5: memref<1x128xf32, #tpu.memory_space<vmem>>, %arg6: memref<128x128xbf16, #tpu.memory_space<vmem>>, %arg7: memref<1x128xf32, #tpu.memory_space<vmem>>, %arg8: memref<2x128xbf16, #tpu.memory_space<vmem>>) attributes {dimension_semantics = [#tpu.dimension_semantics<parallel>], iteration_bounds = array<i64: 1>, scalar_prefetch = 0 : i64, scratch_operands = 0 : i64, tpu.core_type = #tpu.core_type<tc>, window_params = [{transform_indices = @transform_0, window_bounds = array<i64: 2, 784>}, {pipeline_mode = #tpu.pipeline_mode<synchronous>, transform_indices = @transform_1, window_bounds = array<i64: 784, 128>}, {pipeline_mode = #tpu.pipeline_mode<synchronous>, transform_indices = @transform_2, window_bounds = array<i64: 1, 128>}, {pipeline_mode = #tpu.pipeline_mode<synchronous>, transform_indices = @transform_3, window_bounds = array<i64: 128, 128>}, {pipeline_mode = #tpu.pipeline_mode<synchronous>, transform_indices = @transform_4, window_bounds = array<i64: 1, 128>}, {pipeline_mode = #tpu.pipeline_mode<synchronous>, transform_indices = @transform_5, window_bounds = array<i64: 128, 128>}, {pipeline_mode = #tpu.pipeline_mode<synchronous>, transform_indices = @transform_6, window_bounds = array<i64: 1, 128>}, {transform_indices = @transform_7, window_bounds = array<i64: 2, 128>}]} {
    %c0 = arith.constant 0 : index
    %c0_0 = arith.constant 0 : index
    %0 = vector.load %arg1[%c0, %c0_0] : memref<2x784xf32, #tpu.memory_space<vmem>>, vector<2x784xf32>
    %1 = arith.truncf %0 : vector<2x784xf32> to vector<2x784xbf16>
    %c0_1 = arith.constant 0 : index
    %c0_2 = arith.constant 0 : index
    %2 = vector.load %arg2[%c0_1, %c0_2] : memref<784x128xbf16, #tpu.memory_space<vmem>>, vector<784x128xbf16>
    %cst = arith.constant dense<0.000000e+00> : vector<2x128xf32>
    %3 = tpu.matmul %1, %2, %cst {dimension_numbers = #tpu.dot_dimension_numbers<[1], [0], [0], [1], [0, 0, 1, 1], [], []>} : vector<2x784xbf16>, vector<784x128xbf16>, vector<2x128xf32> -> vector<2x128xf32>
    %c0_3 = arith.constant 0 : index
    %c0_4 = arith.constant 0 : index
    %4 = vector.load %arg3[%c0_3, %c0_4] : memref<1x128xf32, #tpu.memory_space<vmem>>, vector<1x128xf32>
    %5 = vector.broadcast %4 : vector<1x128xf32> to vector<2x128xf32>
    %6 = arith.addf %3, %5 : vector<2x128xf32>
    %cst_5 = arith.constant 0.000000e+00 : f32
    %7 = vector.broadcast %cst_5 : f32 to vector<2x128xf32>
    %8 = arith.maximumf %6, %7 : vector<2x128xf32>
    %9 = arith.truncf %8 : vector<2x128xf32> to vector<2x128xbf16>
    %c0_6 = arith.constant 0 : index
    %c0_7 = arith.constant 0 : index
    %10 = vector.load %arg4[%c0_6, %c0_7] : memref<128x128xbf16, #tpu.memory_space<vmem>>, vector<128x128xbf16>
    %cst_8 = arith.constant dense<0.000000e+00> : vector<2x128xf32>
    %11 = tpu.matmul %9, %10, %cst_8 {dimension_numbers = #tpu.dot_dimension_numbers<[1], [0], [0], [1], [0, 0, 1, 1], [], []>} : vector<2x128xbf16>, vector<128x128xbf16>, vector<2x128xf32> -> vector<2x128xf32>
    %c0_9 = arith.constant 0 : index
    %c0_10 = arith.constant 0 : index
    %12 = vector.load %arg5[%c0_9, %c0_10] : memref<1x128xf32, #tpu.memory_space<vmem>>, vector<1x128xf32>
    %13 = vector.broadcast %12 : vector<1x128xf32> to vector<2x128xf32>
    %14 = arith.addf %11, %13 : vector<2x128xf32>
    %cst_11 = arith.constant 0.000000e+00 : f32
    %15 = vector.broadcast %cst_11 : f32 to vector<2x128xf32>
    %16 = arith.maximumf %14, %15 : vector<2x128xf32>
    %17 = arith.truncf %16 : vector<2x128xf32> to vector<2x128xbf16>
    %c0_12 = arith.constant 0 : index
    %c0_13 = arith.constant 0 : index
    %18 = vector.load %arg6[%c0_12, %c0_13] : memref<128x128xbf16, #tpu.memory_space<vmem>>, vector<128x128xbf16>
    %cst_14 = arith.constant dense<0.000000e+00> : vector<2x128xf32>
    %19 = tpu.matmul %17, %18, %cst_14 {dimension_numbers = #tpu.dot_dimension_numbers<[1], [0], [0], [1], [0, 0, 1, 1], [], []>} : vector<2x128xbf16>, vector<128x128xbf16>, vector<2x128xf32> -> vector<2x128xf32>
    %c0_15 = arith.constant 0 : index
    %c0_16 = arith.constant 0 : index
    %20 = vector.load %arg7[%c0_15, %c0_16] : memref<1x128xf32, #tpu.memory_space<vmem>>, vector<1x128xf32>
    %21 = vector.broadcast %20 : vector<1x128xf32> to vector<2x128xf32>
    %22 = arith.addf %19, %21 : vector<2x128xf32>
    %cst_17 = arith.constant dense<0xFF800000> : vector<2xf32>
    %23 = vector.multi_reduction <maximumf>, %22, %cst_17 [1] : vector<2x128xf32> to vector<2xf32>
    %24 = vector.shape_cast %23 : vector<2xf32> to vector<2x1xf32>
    %25 = vector.broadcast %24 : vector<2x1xf32> to vector<2x128xf32>
    %26 = arith.subf %22, %25 : vector<2x128xf32>
    %27 = math.exp %26 : vector<2x128xf32>
    %cst_18 = arith.constant dense<0.000000e+00> : vector<2xf32>
    %28 = vector.multi_reduction <add>, %27, %cst_18 [1] : vector<2x128xf32> to vector<2xf32>
    %29 = vector.shape_cast %28 : vector<2xf32> to vector<2x1xf32>
    %30 = math.log %29 : vector<2x1xf32>
    %31 = vector.broadcast %30 : vector<2x1xf32> to vector<2x128xf32>
    %32 = arith.subf %26, %31 : vector<2x128xf32>
    %33 = arith.truncf %32 : vector<2x128xf32> to vector<2x128xbf16>
    %c0_19 = arith.constant 0 : index
    %c0_20 = arith.constant 0 : index
    %34 = vector.load %arg8[%c0_19, %c0_20] : memref<2x128xbf16, #tpu.memory_space<vmem>>, vector<2x128xbf16>
    tpu.vector_store %arg8[%c0_19, %c0_20], %33 {strides = array<i32>} : memref<2x128xbf16, #tpu.memory_space<vmem>>, vector<2x128xbf16>,
    return
  }
  func.func @transform_0(%arg0: i32) -> (i32, i32) {
    %c0_i32 = arith.constant 0 : i32
    %c0_i32_0 = arith.constant 0 : i32
    return %arg0, %c0_i32 : i32, i32
  }
  func.func @transform_1(%arg0: i32) -> (i32, i32) {
    %c0_i32 = arith.constant 0 : i32
    %c0_i32_0 = arith.constant 0 : i32
    %c0_i32_1 = arith.constant 0 : i32
    return %c0_i32, %c0_i32_0 : i32, i32
  }
  func.func @transform_2(%arg0: i32) -> (i32, i32) {
    %c0_i32 = arith.constant 0 : i32
    %c0_i32_0 = arith.constant 0 : i32
    %c0_i32_1 = arith.constant 0 : i32
    return %c0_i32, %c0_i32_0 : i32, i32
  }
  func.func @transform_3(%arg0: i32) -> (i32, i32) {
    %c0_i32 = arith.constant 0 : i32
    %c0_i32_0 = arith.constant 0 : i32
    %c0_i32_1 = arith.constant 0 : i32
    return %c0_i32, %c0_i32_0 : i32, i32
  }
  func.func @transform_4(%arg0: i32) -> (i32, i32) {
    %c0_i32 = arith.constant 0 : i32
    %c0_i32_0 = arith.constant 0 : i32
    %c0_i32_1 = arith.constant 0 : i32
    return %c0_i32, %c0_i32_0 : i32, i32
  }
  func.func @transform_5(%arg0: i32) -> (i32, i32) {
    %c0_i32 = arith.constant 0 : i32
    %c0_i32_0 = arith.constant 0 : i32
    %c0_i32_1 = arith.constant 0 : i32
    return %c0_i32, %c0_i32_0 : i32, i32
  }
  func.func @transform_6(%arg0: i32) -> (i32, i32) {
    %c0_i32 = arith.constant 0 : i32
    %c0_i32_0 = arith.constant 0 : i32
    %c0_i32_1 = arith.constant 0 : i32
    return %c0_i32, %c0_i32_0 : i32, i32
  }
  func.func @transform_7(%arg0: i32) -> (i32, i32) {
    %c0_i32 = arith.constant 0 : i32
    %c0_i32_0 = arith.constant 0 : i32
    return %arg0, %c0_i32 : i32, i32
  }
}

</mosaic_0001>

<bundles_post_ra>
// kernel: _lambda_.1
= control target key start
LH: loop header
LB: loop body
LE: loop exit
PB: predicated region body
PF: predicated region fallthrough
CT: control target
= control target key end

     0   :  { %12 = vsyncpa [#allocation3], 0  ;;  %s1263_s0 = inlined_call_operand.vmem [shape: f32[2,784], index: 0, kind: input, shape index: {}]   ;;  %s1264_s1 = inlined_call_operand.hbm [shape: bf16[784,128], index: 1, kind: input, shape index: {}]   ;;  %s1265_s2 = inlined_call_operand.vmem [shape: f32[1,128], index: 2, kind: input, shape index: {}]   ;;  %s1266_s3 = inlined_call_operand.vmem [shape: bf16[128,128], index: 3, kind: input, shape index: {}]   ;;  %s1267_s4 = inlined_call_operand.vmem [shape: f32[1,128], index: 4, kind: input, shape index: {}]   ;;  %s1268_s5 = inlined_call_operand.vmem [shape: bf16[128,128], index: 5, kind: input, shape index: {}]   ;;  %s1269_s6 = inlined_call_operand.vmem [shape: f32[1,128], index: 6, kind: input, shape index: {}]   ;;  %s1270_s7 = inlined_call_operand.hbm [shape: bf16[2,128], index: 7, kind: output, shape index: {}]  }
   0x1   :  { %13 = vsyncpa [#allocation4], 0  ;;  %s20_s26 = sshll.u32 %s1264_s1, 4  ;;  %s1150_s27 = smov [#allocation2]   ;;  %s21_s26 = int_to_ptr.hbm [resolvable:$true] %s20_s26 }
   0x2   :  { %s22_s28 = sshll.u32 %s1150_s27, 4  ;;  %s1151_s29 = smov 64   ;;  %s23_s28 = int_to_ptr.vmem [resolvable:$true] %s22_s28 }
   0x3   :  { %s1152_s30 = smov 4  }
   0x4   :  { %28 = dma.hbm_to_vmem [thread:$0]  %s21_s26, 6272, %s23_s28, [#allocation3], %s1151_s29, %s1151_s29, %s1152_s30  }
   0x5   :  { %1146 = dma.done.wait [#allocation3], 6272  }
   0x6   :  { %1147 = vsyncadd [#allocation3], 4294961024  ;;  %v1029_v0 = vld [vmem:[#allocation2 + $0x38] sm:$0xff]  ;;  %v1028_v3 = vld [vmem:[#allocation2 + $0x30] sm:$0xff]  ;;  %vm468_vm0 = vcmask 130048   ;;  %vm729_vm1 = vcmask 1041408  }
   0x7   :  { %v1037_v1 = vld [vmem:[#allocation2 + $0x78] sm:$0xff]  ;;  %472 = vmatpush.bf16.msra.mxu0 %v1029_v0  ;;  %v1036_v4 = vld [vmem:[#allocation2 + $0x70] sm:$0xff]  ;;  %v1027_v8 = vld [vmem:[#allocation2 + $0x28] sm:$0xff]  ;;  %s751_s22 = sshll.u32 %s1270_s7, 4  ;;  %s752_s22 = int_to_ptr.hbm [resolvable:$true] %s751_s22 }
   0x8   :  { %v1045_v2 = vld [vmem:[#allocation2 + $0xb8] sm:$0xff]  ;;  %485 = vmatpush.bf16.msra.mxu1 %v1037_v1  ;;  %v1044_v5 = vld [vmem:[#allocation2 + $0xb0] sm:$0xff]  ;;  %v1035_v9 = vld [vmem:[#allocation2 + $0x68] sm:$0xff] }
   0x9   :  { %498 = vmatpush.bf16.msra.mxu2 %v1045_v2  ;;  %v1053_v6 = vld [vmem:[#allocation2 + $0xf8] sm:$0xff]  ;;  %v1052_v7 = vld [vmem:[#allocation2 + $0xf0] sm:$0xff]  ;;  %v1043_v10 = vld [vmem:[#allocation2 + $0xa8] sm:$0xff] }
   0xa   :  { %511 = vmatpush.bf16.msra.mxu3 %v1053_v6  ;;  %v1051_v11 = vld [vmem:[#allocation2 + $0xe8] sm:$0xff]  ;;  %v1026_v12 = vld [vmem:[#allocation2 + $0x20] sm:$0xff]  ;;  %v44_v15 = vld [vmem:[%s1263_s0] sm:$0xff] }
   0xb   :  { %473 = vmatpush.bf16.msra.mxu0 %v1028_v3  ;;  %v1034_v13 = vld [vmem:[#allocation2 + $0x60] sm:$0xff]  ;;  %48 = vst [vmem:[#allocation1] ss:$4 sm:$0xff] %v44_v15  ;;  %v1025_v17 = vld [vmem:[#allocation2 + $0x18] sm:$0xff]  ;;  %v1024_v22 = vld [vmem:[#allocation2 + $0x10] sm:$0xff] }
   0xc   :  { %486 = vmatpush.bf16.msra.mxu1 %v1036_v4  ;;  %v1042_v14 = vld [vmem:[#allocation2 + $0xa0] sm:$0xff]  ;;  %v1033_v18 = vld [vmem:[#allocation2 + $0x58] sm:$0xff]  ;;  %v1032_v23 = vld [vmem:[#allocation2 + $0x50] sm:$0xff] }
   0xd   :  { %499 = vmatpush.bf16.msra.mxu2 %v1044_v5  ;;  %v1050_v16 = vld [vmem:[#allocation2 + $0xe0] sm:$0xff]  ;;  %v1041_v20 = vld [vmem:[#allocation2 + $0x98] sm:$0xff]  ;;  %v1040_v24 = vld [vmem:[#allocation2 + $0x90] sm:$0xff] }
   0xe   :  { %512 = vmatpush.bf16.msra.mxu3 %v1052_v7  ;;  %v45_v19 = vld [vmem:[%s1263_s0 + $0x8] sm:$0x3f]  ;;  %v1049_v21 = vld [vmem:[#allocation2 + $0xd8] sm:$0xff]  ;;  %v1048_v25 = vld [vmem:[#allocation2 + $0xd0] sm:$0xff] }
   0xf   :  { %474 = vmatpush.bf16.msra.mxu0 %v1027_v8  ;;  %50 = vst [vmem:[#allocation1 + $0x20] ss:$4 sm:$0xff] %v45_v19  ;;  %v1023_v26 = vld [vmem:[#allocation2 + $0x8] sm:$0xff]  ;;  %v1022_v29 = vld [vmem:[#allocation2] sm:$0xff]  ;;  %v1061_v34 = vld [vmem:[#allocation2 + $0x138] sm:$0xff] }
  0x10   :  { %487 = vmatpush.bf16.msra.mxu1 %v1035_v9  ;;  %v1031_v27 = vld [vmem:[#allocation2 + $0x48] sm:$0xff]  ;;  %v1030_v30 = vld [vmem:[#allocation2 + $0x40] sm:$0xff]  ;;  %v1069_v35 = vld [vmem:[#allocation2 + $0x178] sm:$0xff] }
  0x11   :  { %500 = vmatpush.bf16.msra.mxu2 %v1043_v10  ;;  %v1039_v28 = vld [vmem:[#allocation2 + $0x88] sm:$0xff]  ;;  %v1038_v36 = vld [vmem:[#allocation2 + $0x80] sm:$0xff]  ;;  %v1060_v43 = vld [vmem:[#allocation2 + $0x130] sm:$0xff] }
  0x12   :  { %513 = vmatpush.bf16.msra.mxu3 %v1051_v11  ;;  %v1047_v31 = vld [vmem:[#allocation2 + $0xc8] sm:$0xff]  ;;  %v51_v32 = vld.sshfl [vmem:[#allocation1] sm:$0xff pattern:$0x73625140]  ;;  %v1046_v40 = vld [vmem:[#allocation2 + $0xc0] sm:$0xff] }
  0x13   :  { %475 = vmatpush.bf16.msra.mxu0 %v1026_v12  ;;  %v52_v33 = vld.sshfl [vmem:[#allocation1 + $0x8] sm:$0xff pattern:$0x73625140]  ;;  %v53_v37 = vld.sshfl [vmem:[#allocation1 + $0x10] sm:$0xff pattern:$0x73625140]  ;;  %v65_v38 = vpack.c.bf16 %v51_v32, %v51_v32 }
  0x14   :  { %488 = vmatpush.bf16.msra.mxu1 %v1034_v13  ;;  %v66_v39 = vpack.c.bf16 %v52_v33, %v52_v33  ;;  %v1070_v41 = vld [vmem:[#allocation2 + $0x180] sm:$0xff]  ;;  %v54_v42 = vld.sshfl [vmem:[#allocation1 + $0x18] sm:$0xff pattern:$0x73625140]  ;;  %v67_v45 = vpack.c.bf16 %v53_v37, %v53_v37  ;;  %v1059_v47 = vld [vmem:[#allocation2 + $0x128] sm:$0xff] }
  0x15   :  { %501 = vmatpush.bf16.msra.mxu2 %v1042_v14  ;;  %v1068_v44 = vld [vmem:[#allocation2 + $0x170] sm:$0xff]  ;;  %v68_v46 = vpack.c.bf16 %v54_v42, %v54_v42  ;;  %v1067_v48 = vld [vmem:[#allocation2 + $0x168] sm:$0xff]  ;;  %v1058_v49 = vld [vmem:[#allocation2 + $0x120] sm:$0xff] }
  0x16   :  { %514 = vmatpush.bf16.msra.mxu3 %v1050_v16  ;;  %v1066_v50 = vld [vmem:[#allocation2 + $0x160] sm:$0xff]  ;;  %v1057_v51 = vld [vmem:[#allocation2 + $0x118] sm:$0xff]  ;;  %v57_v53 = vld.sshfl [vmem:[#allocation1 + $0x30] sm:$0xff pattern:$0x73625140] }
  0x17   :  { %476 = vmatpush.bf16.msra.mxu0 %v1025_v17  ;;  %v1065_v52 = vld [vmem:[#allocation2 + $0x158] sm:$0xff]  ;;  %v1056_v54 = vld [vmem:[#allocation2 + $0x110] sm:$0xff]  ;;  %v71_v56 = vpack.c.bf16 %v57_v53, %v57_v53  ;;  %v1055_v57 = vld [vmem:[#allocation2 + $0x108] sm:$0xff] }
  0x18   :  { %489 = vmatpush.bf16.msra.mxu1 %v1033_v18  ;;  %v1064_v55 = vld [vmem:[#allocation2 + $0x150] sm:$0xff]  ;;  %v1063_v58 = vld [vmem:[#allocation2 + $0x148] sm:$0xff]  ;;  %v1054_v59 = vld [vmem:[#allocation2 + $0x100] sm:$0xff] }
  0x19   :  { %502 = vmatpush.bf16.msra.mxu2 %v1041_v20  ;;  %v1062_v60 = vld [vmem:[#allocation2 + $0x140] sm:$0xff]  ;;  %v55_v61 = vld.sshfl [vmem:[#allocation1 + $0x20] sm:$0xff pattern:$0x73625140]  ;;  %v1078_v1 = vld [vmem:[%s1266_s3 + $0x38] sm:$0xff] }
  0x1a   :  { %515 = vmatpush.bf16.msra.mxu3 %v1049_v21  ;;  %v56_v62 = vld.sshfl [vmem:[#allocation1 + $0x28] sm:$0xff pattern:$0x73625140]  ;;  %v69_v63 = vpack.c.bf16 %v55_v61, %v55_v61  ;;  %v1077_v2 = vld [vmem:[%s1266_s3 + $0x30] sm:$0xff]  ;;  %v1075_v4 = vld [vmem:[%s1266_s3 + $0x20] sm:$0xff] }
  0x1b   :  { %477 = vmatpush.bf16.msra.mxu0 %v1024_v22  ;;  %v70_v0 = vpack.c.bf16 %v56_v62, %v56_v62  ;;  %v1076_v3 = vld [vmem:[%s1266_s3 + $0x28] sm:$0xff]  ;;  %v1074_v5 = vld [vmem:[%s1266_s3 + $0x18] sm:$0xff]  ;;  %v1073_v6 = vld [vmem:[%s1266_s3 + $0x10] sm:$0xff] }
  0x1c   :  { %490 = vmatpush.bf16.msra.mxu1 %v1032_v23  ;;  %v1072_v7 = vld [vmem:[%s1266_s3 + $0x8] sm:$0xff]  ;;  %v1071_v10 = vld [vmem:[%s1266_s3] sm:$0xff]  ;;  %v1086_v13 = vld [vmem:[%s1268_s5 + $0x38] sm:$0xff] }
  0x1d   :  { %503 = vmatpush.bf16.msra.mxu2 %v1040_v24  ;;  %v1085_v16 = vld [vmem:[%s1268_s5 + $0x30] sm:$0xff]  ;;  %v1091_v17 = vld [vmem:[%s1265_s2] ss:$0 sm:$0xff]  ;;  %v1084_v18 = vld [vmem:[%s1268_s5 + $0x28] sm:$0xff] }
  0x1e   :  { %516 = vmatpush.bf16.msra.mxu3 %v1048_v25  ;;  %v1083_v22 = vld [vmem:[%s1268_s5 + $0x20] sm:$0xff]  ;;  %v1082_v24 = vld [vmem:[%s1268_s5 + $0x18] sm:$0xff] }
  0x1f   :  { %478 = vmatpush.bf16.msra.mxu0 %v1023_v26 }
  0x20   :  { %491 = vmatpush.bf16.msra.mxu1 %v1031_v27  ;;  %v1081_v27 = vld [vmem:[%s1268_s5 + $0x10] sm:$0xff] }
  0x21   :  { %504 = vmatpush.bf16.msra.mxu2 %v1039_v28 }
  0x22   :  { %517 = vmatpush.bf16.msra.mxu3 %v1047_v31 }
  0x23   :  { %479 = vmatpush.bf16.msra.mxu0 %v1022_v29 }
  0x24   :  { %492 = vmatpush.bf16.msra.mxu1 %v1030_v30 }
  0x25   :  { %505 = vmatpush.bf16.msra.mxu2 %v1038_v36 }
  0x26   :  { %480 = vmatmul.bf16.vlgmr.msra.gmra.mxu0 %v65_v38  ;;  %518 = vmatpush.bf16.msra.mxu3 %v1046_v40  ;;  %v1079_v40 = vld [vmem:[%s1268_s5] sm:$0xff] }
  0x27   :  { %524 = vmatpush.bf16.msrb.mxu0 %v1061_v34  ;;  %493 = vmatmul.bf16.vlgmr.msra.gmra.mxu1 %v66_v39  ;;  %v1080_v39 = vld [vmem:[%s1268_s5 + $0x8] sm:$0xff] }
  0x28   :  { %537 = vmatpush.bf16.msrb.mxu1 %v1069_v35  ;;  %506 = vmatmul.bf16.vlgmr.msra.gmra.mxu2 %v67_v45 }
  0x29   :  { %557 = vmatpush.bf16.msrb.mxu2 %v1070_v41  ;;  %519 = vmatmul.bf16.vlgmr.msra.gmra.mxu3 %v68_v46  ;;  %v1092_v41 = vld [vmem:[%s1267_s4] ss:$0 sm:$0xff]  ;;  %s1153_s4 = smov [#allocation5]  }
  0x2a   :  { %633 = vmatpush.bf16.msrb.mxu3 %v1078_v1  ;;  %s749_s5 = sshll.u32 %s1153_s4, 4  ;;  %s750_s5 = int_to_ptr.vmem [resolvable:$true] %s749_s5 }
  0x2b   :  { %525 = vmatpush.bf16.msrb.mxu0 %v1060_v43 }
  0x2c   :  { %538 = vmatpush.bf16.msrb.mxu1 %v1068_v44 }
  0x2d   :  { %716 = vmatpush.bf16.msra.mxu2 %v1086_v13 }
  0x2e   :  { %634 = vmatpush.bf16.msrb.mxu3 %v1077_v2 }
  0x2f   :  { %526 = vmatpush.bf16.msrb.mxu0 %v1059_v47  ;;  %v1093_v47 = vld [vmem:[%s1269_s6] ss:$0 sm:$0xff] }
  0x30   :  { %539 = vmatpush.bf16.msrb.mxu1 %v1067_v48 }
  0x31   :  { %717 = vmatpush.bf16.msra.mxu2 %v1085_v16 }
  0x32   :  { %635 = vmatpush.bf16.msrb.mxu3 %v1076_v3 }
  0x33   :  { %527 = vmatpush.bf16.msrb.mxu0 %v1058_v49 }
  0x34   :  { %540 = vmatpush.bf16.msrb.mxu1 %v1066_v50 }
  0x35   :  { %718 = vmatpush.bf16.msra.mxu2 %v1084_v18 }
  0x36   :  { %636 = vmatpush.bf16.msrb.mxu3 %v1075_v4 }
  0x37   :  { %528 = vmatpush.bf16.msrb.mxu0 %v1057_v51 }
  0x38   :  { %541 = vmatpush.bf16.msrb.mxu1 %v1065_v52  ;;  %957 = vmatmul.msk.bf16.vlgmr.msrb.gmra.mxu2 %vm468_vm0, %v71_v56 }
  0x39   :  { %719 = vmatpush.bf16.msra.mxu2 %v1083_v22 }
  0x3a   :  { %637 = vmatpush.bf16.msrb.mxu3 %v1074_v5 }
  0x3b   :  { %529 = vmatpush.bf16.msrb.mxu0 %v1056_v54 }
  0x3c   :  { %542 = vmatpush.bf16.msrb.mxu1 %v1064_v55 }
  0x3d   :  { %720 = vmatpush.bf16.msra.mxu2 %v1082_v24 }
  0x3e   :  { %638 = vmatpush.bf16.msrb.mxu3 %v1073_v6 }
  0x3f   :  { %530 = vmatpush.bf16.msrb.mxu0 %v1055_v57 }
  0x40   :  { %543 = vmatpush.bf16.msrb.mxu1 %v1063_v58 }
  0x41   :  { %721 = vmatpush.bf16.msra.mxu2 %v1081_v27 }
  0x42   :  { %639 = vmatpush.bf16.msrb.mxu3 %v1072_v7 }
  0x43   :  { %531 = vmatpush.bf16.msrb.mxu0 %v1054_v59 }
  0x44   :  { %544 = vmatpush.bf16.msrb.mxu1 %v1062_v60 }
  0x45   :  { %722 = vmatpush.bf16.msra.mxu2 %v1080_v39 }
  0x46   :  { %532 = vmatmul.bf16.vlgmr.msrb.gmra.mxu0 %v69_v63  ;;  %640 = vmatpush.bf16.msrb.mxu3 %v1071_v10 }
  0x47   :  { %545 = vmatmul.bf16.vlgmr.msrb.gmra.mxu1 %v70_v0 }
  0x49   :  { %723 = vmatpush.bf16.msra.mxu2 %v1079_v40 }
  0xa3   :  { %v481_v8 = vpop.f32.mrf.mxu0 }
  0xa4   :  { %v494_v9 = vpop.f32.mrf.mxu1  ;;  %v482_v19 = vadd.f32 %v1091_v17, %v481_v8 }
  0xa6   :  { %v495_v23 = vadd.f32 %v494_v9, %v482_v19 }
  0xab   :  { %v483_v11 = vpop.f32.mrf.mxu0  ;;  %v507_v14 = vpop.f32.mrf.mxu2 }
  0xac   :  { %v496_v12 = vpop.f32.mrf.mxu1  ;;  %v520_v15 = vpop.f32.mrf.mxu3  ;;  %v508_v25 = vadd.f32 %v507_v14, %v495_v23 }
  0xae   :  { %v521_v28 = vadd.f32 %v520_v15, %v508_v25 }
  0xb3   :  { %v509_v20 = vpop.f32.mrf.mxu2 }
  0xb4   :  { %v522_v21 = vpop.f32.mrf.mxu3 }
  0xbb   :  { %v559_v26 = vpop.f32.mrf.mxu2 }
  0xc3   :  { %v533_v29 = vpop.f32.mrf.mxu0  ;;  %v561_v33 = vpop.f32.mrf.mxu2 }
  0xc4   :  { %v546_v30 = vpop.f32.mrf.mxu1  ;;  %v534_v31 = vadd.f32 %v533_v29, %v521_v28 }
  0xc6   :  { %v547_v32 = vadd.f32 %v546_v30, %v534_v31 }
  0xc8   :  { %v560_v34 = vadd.f32 %v559_v26, %v547_v32 }
  0xca   :  { %v563_v35 = vmax.f32 %v560_v34, 0.0 }
  0xcb   :  { %v535_v36 = vpop.f32.mrf.mxu0 }
  0xcc   :  { %v548_v37 = vpop.f32.mrf.mxu1  ;;  %v564_v38 = vpack.c.bf16 %v563_v35, %v563_v35 }
  0xce   :  { %641 = vmatmul.bf16.vlgmr.msrb.gmra.mxu3 %v564_v38 }
 0x151   :  { %v642_v42 = vpop.f32.mrf.mxu3 }
 0x152   :  { %v643_v43 = vadd.f32 %v1092_v41, %v642_v42 }
 0x154   :  { %v646_v44 = vmax.f32 %v643_v43, 0.0 }
 0x156   :  { %v647_v45 = vpack.c.bf16 %v646_v44, %v646_v44 }
 0x158   :  { %724 = vmatmul.bf16.vlgmr.msra.gmra.mxu2 %v647_v45 }
 0x159   :  { %v644_v46 = vpop.f32.mrf.mxu3 }
 0x1db   :  { %v725_v48 = vpop.f32.mrf.mxu2 }
 0x1dc   :  { %v726_v49 = vadd.f32 %v1093_v47, %v725_v48 }
 0x1de   :  { %v730_v50 = vsel %vm729_vm1, %v726_v49, -inf }
 0x1df   :  { %731 = vmax.xlane.f32.xlu0 %v730_v50 }
 0x1e3   :  { %v727_v51 = vpop.f32.mrf.mxu2 }
 0x252   :  { %v732_v52 = vpop.xlane.xlu0 %731 }
 0x253   :  { %v733_v53 = vsub.f32 %v726_v49, %v732_v52 }
 0x255   :  { %v734_v54 = vmul.f32 1.442695, %v733_v53 }
 0x257   :  { %1094 = vpow2.f32 %v734_v54 }
 0x25d   :  { %v1095_v55 = vpop.eup %1094 }
 0x25e   :  { %v736_v56 = vsel %vm729_vm1, %v1095_v55, 0.0 }
 0x25f   :  { %737 = vadd.xlane.f32.xlu0 %v736_v56 }
 0x2d2   :  { %v738_v57 = vpop.xlane.xlu0 %737 }
 0x2d3   :  { %1096 = vlog2.f32 %v738_v57 }
 0x2d9   :  { %v1097_v58 = vpop.eup %1096 }
 0x2da   :  { %v740_v59 = vmul.f32 0.6931472, %v1097_v58 }
 0x2dc   :  { %v741_v60 = vsub.f32 %v733_v53, %v740_v59 }
 0x2de   :  { %v742_v61 = vpack.c.bf16 %v741_v60, %v741_v60 }
 0x2e0   :  { %743 = vst [vmem:[#allocation5] sm:$0x1] %v742_v61 }
 0x2e1   :  { %754 = dma.vmem_to_hbm [thread:$0]  %s750_s5, 16, %s752_s22, [#allocation4]  }
 0x2e2   :  { %1148 = dma.done.wait [#allocation4], 16  }
 0x2e3   :  { %1149 = vsyncadd [#allocation4], 4294967280 }
 0x2e4   :  { %759 = vsyncpa [#allocation3], 1 }
 0x2e5   :  { %760 = vsyncpa [#allocation4], 1 }

</bundles_post_ra>
